<compile_context>
chip_gen: v6e
topology: v6e:2x2x1
jax: 0.10.0
libtpu: 0.0.40
codegen_flags: <defaults>
</compile_context>

<pallas_src>
import functools

import jax
import jax.numpy as jnp
import numpy as np
from jax.experimental import pallas as pl
from jax.experimental.pallas import tpu as pltpu


def gnn_kernel(adj_ref, invdeg_ref, x_ref, w_ref, b_ref, out_ref, *, G, N):
    # adj_ref:    [2M, M] bf16, M = G*N. rows 0:M  = block-diag(A + I)  (GIN sum incl. self)
    #                                    rows M:2M = block-diag(A)      (SAGE raw adjacency)
    # invdeg_ref: [M, 1]  f32, 1 / max(in_degree, 1)
    # x_ref:      [M, H]  bf16 stacked node features (G graphs x N nodes)
    # w_ref:      [5H, H] bf16 packed weight slab (pre-transposed to [in, out])
    # b_ref:      [8, H]  f32 packed bias slab (+ lin2 weight row + lin2 bias scalar)
    # out_ref:    [G_pad, 128] f32; row g holds graph g's logit broadcast across lanes
    M, H = x_ref.shape
    G_pad = out_ref.shape[0]

    a_self = adj_ref[0:M, :]          # block-diag (A + I), bf16
    a_raw = adj_ref[M:2 * M, :]       # block-diag A, bf16
    x = x_ref[...]                    # bf16

    # Static sublane-aligned slices of the packed weight slab (no lane shifting).
    gin_w1 = w_ref[0:H, :]
    gin_w2 = w_ref[H:2 * H, :]
    sage_ws = w_ref[2 * H:3 * H, :]
    sage_wn = w_ref[3 * H:4 * H, :]
    lin1_w = w_ref[4 * H:5 * H, :]

    bvec = b_ref[...]                 # single [8, H] f32 load, then vreg-local row selects
    gin_b1 = bvec[0:1, :]
    gin_b2 = bvec[1:2, :]
    sage_b = bvec[2:3, :]             # fc_self bias + fc_neigh bias (pre-summed)
    lin1_b = bvec[3:4, :]
    lin2_w_row = bvec[4:5, :]         # linear_2 weight stored as a row [1, H]
    lin2_b = bvec[5:6, 0:1]           # linear_2 bias scalar [1, 1]

    # ---- GINConv (sum aggregation incl. self, eps=0): MLP((A + I) @ x) ----
    gin_in = jnp.dot(a_self, x, preferred_element_type=jnp.float32)           # [M, H] f32
    h = jnp.dot(gin_in.astype(jnp.bfloat16), gin_w1,
                preferred_element_type=jnp.float32) + gin_b1
    h = jnp.maximum(h, 0.0)                                                   # ReLU in GIN MLP
    h = jnp.dot(h.astype(jnp.bfloat16), gin_w2,
                preferred_element_type=jnp.float32) + gin_b2

    # ---- SAGEConv (mean aggregation): fc_self(h) + fc_neigh(mean_neigh) ----
    # raw bf16 adjacency matmul, then f32 reciprocal-degree scaling on the VPU.
    h_bf = h.astype(jnp.bfloat16)
    neigh = jnp.dot(a_raw, h_bf, preferred_element_type=jnp.float32) * invdeg_ref[...]
    h = (jnp.dot(h_bf, sage_ws, preferred_element_type=jnp.float32)
         + jnp.dot(neigh.astype(jnp.bfloat16), sage_wn, preferred_element_type=jnp.float32)
         + sage_b)

    # ---- MaxPooling readout: per-graph max over its N rows -> [G, H] ----
    pooled = jnp.concatenate(
        [jnp.max(h[g * N:(g + 1) * N, :], axis=0, keepdims=True) for g in range(G)],
        axis=0)

    # ---- head: ReLU(linear_1) -> (dropout p=0.0, eval -> identity) -> linear_2 ----
    o1 = jnp.dot(pooled.astype(jnp.bfloat16), lin1_w,
                 preferred_element_type=jnp.float32) + lin1_b
    o1 = jnp.maximum(o1, 0.0)
    # linear_2 as a VPU multiply + lane reduction (no M=G MXU matmul).
    logits = jnp.sum(o1 * lin2_w_row, axis=-1, keepdims=True) + lin2_b        # [G, 1]
    if G_pad > G:
        logits = jnp.concatenate(
            [logits, jnp.zeros((G_pad - G, 1), jnp.float32)], axis=0)
    # Single lane-dense store (logit of graph g broadcast across the 128 lanes of row g).
    out_ref[...] = jnp.broadcast_to(logits, (G_pad, 128))


def gnn_forward(adj_ops, inv_deg, x, w_slab, b_slab, *, graphs_per_step, nodes):
    """Stacked-graph forward: grid=(num_steps,), G graphs per step as one M=G*N row slab."""
    S, two_m, M = adj_ops.shape
    _, _, H = x.shape
    G, N = graphs_per_step, nodes
    assert two_m == 2 * M and M == G * N
    G_pad = ((G + 7) // 8) * 8

    flops_per_step = 4 * M * M * H + 8 * M * H * H + 2 * G * H * H + 2 * G * H
    bytes_accessed = ((adj_ops.size + x.size + w_slab.size) * 2
                      + (inv_deg.size + b_slab.size) * 4
                      + S * G_pad * 128 * 4)

    out = pl.pallas_call(
        functools.partial(gnn_kernel, G=G, N=N),
        out_shape=jax.ShapeDtypeStruct((S, G_pad, 128), jnp.float32),
        grid=(S,),
        in_specs=[
            pl.BlockSpec((None, 2 * M, M), lambda s: (s, 0, 0)),   # block-diag adjacency ops (bf16)
            pl.BlockSpec((None, M, 1), lambda s: (s, 0, 0)),       # 1/deg column (f32)
            pl.BlockSpec((None, M, H), lambda s: (s, 0, 0)),       # stacked node features (bf16)
            pl.BlockSpec((5 * H, H), lambda s: (0, 0)),            # weight slab (VMEM-resident)
            pl.BlockSpec((8, H), lambda s: (0, 0)),                # bias slab (VMEM-resident)
        ],
        out_specs=pl.BlockSpec((None, G_pad, 128), lambda s: (s, 0, 0)),
        compiler_params=pltpu.CompilerParams(
            dimension_semantics=("parallel",)),                    # 2 TCs on v7x split the steps
        cost_estimate=pl.CostEstimate(
            flops=S * flops_per_step, transcendentals=0,
            bytes_accessed=bytes_accessed),
    )(adj_ops, inv_deg, x, w_slab, b_slab)
    # lane 0 of row g holds graph g's logit
    return out[:, :G, 0].reshape(S * G, 1, 1)


def make_params(key, hidden):
    """Deterministic synthetic parameters. nn.Linear weight [out, in] is stored
    pre-transposed as [in, out]; biases stored as [1, out] for broadcasting."""
    ks = jax.random.split(key, 12)

    def w(k, n_in, n_out):
        return (jax.random.normal(k, (n_in, n_out), jnp.float32) / np.sqrt(n_in)).astype(jnp.float32)

    def b(k, n_out):
        return (0.01 * jax.random.normal(k, (1, n_out), jnp.float32)).astype(jnp.float32)

    H = hidden
    return {
        # GIN apply_func: Linear(H,H) -> ReLU -> Linear(H,H)
        "gin_w1": w(ks[0], H, H), "gin_b1": b(ks[1], H),
        "gin_w2": w(ks[2], H, H), "gin_b2": b(ks[3], H),
        # SAGEConv('mean'): fc_self and fc_neigh
        "sage_ws": w(ks[4], H, H), "sage_bs": b(ks[5], H),
        "sage_wn": w(ks[6], H, H), "sage_bn": b(ks[7], H),
        # head
        "lin1_w": w(ks[8], H, H), "lin1_b": b(ks[9], H),
        "lin2_w": w(ks[10], H, 1), "lin2_b": b(ks[11], 1),
    }


def pack_params(p, H):
    """Pack 12 tensors into one bf16 weight slab [5H, H] and one f32 bias slab [8, H]."""
    w_slab = jnp.concatenate(
        [p["gin_w1"], p["gin_w2"], p["sage_ws"], p["sage_wn"], p["lin1_w"]],
        axis=0).astype(jnp.bfloat16)
    b_slab = jnp.zeros((8, H), jnp.float32)
    b_slab = b_slab.at[0, :].set(p["gin_b1"][0])
    b_slab = b_slab.at[1, :].set(p["gin_b2"][0])
    b_slab = b_slab.at[2, :].set(p["sage_bs"][0] + p["sage_bn"][0])  # combined SAGE bias
    b_slab = b_slab.at[3, :].set(p["lin1_b"][0])
    b_slab = b_slab.at[4, :].set(p["lin2_w"][:, 0])                  # lin2 weight as a row
    b_slab = b_slab.at[5, 0].set(p["lin2_b"][0, 0])                  # lin2 bias scalar
    return w_slab, b_slab


def make_stacked_inputs(adj, x, graphs_per_step):
    """Precompute per-step block-diagonal (A+I) and A slabs (bf16), the f32 1/deg column,
    and the stacked bf16 node features."""
    B, N, _ = adj.shape
    H = x.shape[-1]
    G = graphs_per_step
    assert B % G == 0
    S = B // G
    M = G * N

    eye = jnp.eye(N, dtype=jnp.float32)
    a_self = adj + eye[None, :, :]                              # A + I per graph
    inv_deg = 1.0 / jnp.maximum(jnp.sum(adj, axis=2), 1.0)      # [B, N], in-degree

    def block_diag(blocks):                                     # [G, N, N] -> [M, M]
        out = jnp.zeros((M, M), jnp.float32)
        for g in range(G):
            out = out.at[g * N:(g + 1) * N, g * N:(g + 1) * N].set(blocks[g])
        return out

    steps = []
    for s in range(S):
        sl = slice(s * G, (s + 1) * G)
        steps.append(jnp.concatenate([block_diag(a_self[sl]), block_diag(adj[sl])], axis=0))
    adj_ops = jnp.stack(steps, axis=0).astype(jnp.bfloat16)     # [S, 2M, M], exact 0/1 in bf16
    inv_deg = inv_deg.reshape(S, M, 1).astype(jnp.float32)      # [S, M, 1]
    x_stacked = x.reshape(S, M, H).astype(jnp.bfloat16)         # [S, M, H]
    return adj_ops, inv_deg, x_stacked


def reference_forward_f32(adj, x, p):
    """Pure-f32 pure-JAX reference (single graph) matching the PyTorch module."""
    agg = adj @ x + x
    h = jnp.maximum(agg @ p["gin_w1"] + p["gin_b1"], 0.0) @ p["gin_w2"] + p["gin_b2"]
    deg = jnp.maximum(jnp.sum(adj, axis=1, keepdims=True), 1.0)
    neigh = (adj @ h) / deg
    h = h @ p["sage_ws"] + p["sage_bs"] + neigh @ p["sage_wn"] + p["sage_bn"]
    pooled = jnp.max(h, axis=0, keepdims=True)
    o1 = jnp.maximum(pooled @ p["lin1_w"] + p["lin1_b"], 0.0)
    return o1 @ p["lin2_w"] + p["lin2_b"]


def reference_forward_bf16(adj, x, p):
    """Reference mirroring the kernel's bf16-operand / f32-accumulate quantization points."""
    r = lambda v: v.astype(jnp.bfloat16).astype(jnp.float32)
    x = r(x)
    agg = adj @ x + x
    h = jnp.maximum(r(agg) @ r(p["gin_w1"]) + p["gin_b1"], 0.0)
    h = r(h) @ r(p["gin_w2"]) + p["gin_b2"]
    deg = jnp.maximum(jnp.sum(adj, axis=1, keepdims=True), 1.0)
    h_b = r(h)
    neigh = (adj @ h_b) / deg
    h = (h_b @ r(p["sage_ws"]) + r(neigh) @ r(p["sage_wn"])
         + p["sage_bs"] + p["sage_bn"])
    pooled = jnp.max(h, axis=0, keepdims=True)
    o1 = jnp.maximum(r(pooled) @ r(p["lin1_w"]) + p["lin1_b"], 0.0)
    return jnp.sum(o1 * p["lin2_w"][:, 0][None, :], axis=-1, keepdims=True) + p["lin2_b"]


if __name__ == "__main__":
    B = 8           # graphs per call
    N = 32          # nodes per graph
    H = 32          # hidden_units
    G = 4           # graphs stacked per grid step -> M = 128 MXU rows (use 8 on v6e for M=256)

    key = jax.random.PRNGKey(0)
    k_x, k_p, k_a = jax.random.split(key, 3)

    # Node features x: [B, N, H] (GIN's first Linear expects hidden_units inputs).
    x = jax.random.normal(k_x, (B, N, H), jnp.float32)

    # Random directed graphs (no self loops) -> dense adjacency [B, N, N],
    # A[b, v, u] = 1 for an edge u -> v.
    adj = (jax.random.uniform(k_a, (B, N, N)) < 0.15).astype(jnp.float32)
    adj = adj * (1.0 - jnp.eye(N, dtype=jnp.float32))

    params = make_params(k_p, H)
    w_slab, b_slab = pack_params(params, H)
    adj_ops, inv_deg, x_stacked = make_stacked_inputs(adj, x, G)

    logits = gnn_forward(adj_ops, inv_deg, x_stacked, w_slab, b_slab,
                         graphs_per_step=G, nodes=N)                  # [B, 1, 1]
    jax.block_until_ready(logits)

    # Tight check against a reference with the same bf16 operand quantization.
    ref_bf = jax.vmap(lambda a, xx: reference_forward_bf16(a, xx, params))(adj, x)
    np.testing.assert_allclose(np.asarray(logits), np.asarray(ref_bf), rtol=5e-3, atol=5e-3)

    # Loose check against the full-f32 reference (bounds the bf16 quantization drift).
    ref_f32 = jax.vmap(lambda a, xx: reference_forward_f32(a, xx, params))(adj, x)
    np.testing.assert_allclose(np.asarray(logits), np.asarray(ref_f32), rtol=1e-1, atol=1e-1)

    # TODO(synk): dropout is a no-op here (p=0.0 / eval mode); training-mode dropout
    # would use pltpu.prng_seed + pltpu.prng_random_bits.
    print("KERNEL_OK")
</pallas_src>

<mosaic_0001>
module attributes {stable_mosaic.version = 11 : i64} {
  func.func @gnn_kernel(%arg0: i32, %arg1: memref<1x256x128xbf16, #tpu.memory_space<vmem>>, %arg2: memref<1x128x1xf32, #tpu.memory_space<vmem>>, %arg3: memref<1x128x32xbf16, #tpu.memory_space<vmem>>, %arg4: memref<160x32xbf16, #tpu.memory_space<vmem>>, %arg5: memref<8x32xf32, #tpu.memory_space<vmem>>, %arg6: memref<1x8x128xf32, #tpu.memory_space<vmem>>) attributes {dimension_semantics = [#tpu.dimension_semantics<parallel>], iteration_bounds = array<i64: 2>, scalar_prefetch = 0 : i64, scratch_operands = 0 : i64, tpu.core_type = #tpu.core_type<tc>, window_params = [{transform_indices = @transform_0, window_bounds = array<i64: 1, 256, 128>}, {transform_indices = @transform_1, window_bounds = array<i64: 1, 128, 1>}, {transform_indices = @transform_2, window_bounds = array<i64: 1, 128, 32>}, {pipeline_mode = #tpu.pipeline_mode<synchronous>, transform_indices = @transform_3, window_bounds = array<i64: 160, 32>}, {pipeline_mode = #tpu.pipeline_mode<synchronous>, transform_indices = @transform_4, window_bounds = array<i64: 8, 32>}, {transform_indices = @transform_5, window_bounds = array<i64: 1, 8, 128>}]} {
    %c0 = arith.constant 0 : index
    %c0_0 = arith.constant 0 : index
    %c0_1 = arith.constant 0 : index
    %0 = vector.load %arg1[%c0, %c0_0, %c0_1] : memref<1x256x128xbf16, #tpu.memory_space<vmem>>, vector<1x128x128xbf16>
    %1 = vector.shape_cast %0 : vector<1x128x128xbf16> to vector<128x128xbf16>
    %c0_2 = arith.constant 0 : index
    %c128 = arith.constant 128 : index
    %c0_3 = arith.constant 0 : index
    %2 = vector.load %arg1[%c0_2, %c128, %c0_3] : memref<1x256x128xbf16, #tpu.memory_space<vmem>>, vector<1x128x128xbf16>
    %3 = vector.shape_cast %2 : vector<1x128x128xbf16> to vector<128x128xbf16>
    %c0_4 = arith.constant 0 : index
    %c0_5 = arith.constant 0 : index
    %c0_6 = arith.constant 0 : index
    %4 = vector.load %arg3[%c0_4, %c0_5, %c0_6] : memref<1x128x32xbf16, #tpu.memory_space<vmem>>, vector<1x128x32xbf16>
    %5 = vector.shape_cast %4 : vector<1x128x32xbf16> to vector<128x32xbf16>
    %c0_7 = arith.constant 0 : index
    %c0_8 = arith.constant 0 : index
    %6 = vector.load %arg4[%c0_7, %c0_8] : memref<160x32xbf16, #tpu.memory_space<vmem>>, vector<32x32xbf16>
    %c32 = arith.constant 32 : index
    %c0_9 = arith.constant 0 : index
    %7 = vector.load %arg4[%c32, %c0_9] : memref<160x32xbf16, #tpu.memory_space<vmem>>, vector<32x32xbf16>
    %c64 = arith.constant 64 : index
    %c0_10 = arith.constant 0 : index
    %8 = vector.load %arg4[%c64, %c0_10] : memref<160x32xbf16, #tpu.memory_space<vmem>>, vector<32x32xbf16>
    %c96 = arith.constant 96 : index
    %c0_11 = arith.constant 0 : index
    %9 = vector.load %arg4[%c96, %c0_11] : memref<160x32xbf16, #tpu.memory_space<vmem>>, vector<32x32xbf16>
    %c128_12 = arith.constant 128 : index
    %c0_13 = arith.constant 0 : index
    %10 = vector.load %arg4[%c128_12, %c0_13] : memref<160x32xbf16, #tpu.memory_space<vmem>>, vector<32x32xbf16>
    %c0_14 = arith.constant 0 : index
    %c0_15 = arith.constant 0 : index
    %11 = vector.load %arg5[%c0_14, %c0_15] : memref<8x32xf32, #tpu.memory_space<vmem>>, vector<8x32xf32>
    %12 = vector.extract_strided_slice %11 {offsets = [0, 0], sizes = [1, 32], strides = [1, 1]} : vector<8x32xf32> to vector<1x32xf32>
    %13 = vector.extract_strided_slice %11 {offsets = [1, 0], sizes = [1, 32], strides = [1, 1]} : vector<8x32xf32> to vector<1x32xf32>
    %14 = vector.extract_strided_slice %11 {offsets = [2, 0], sizes = [1, 32], strides = [1, 1]} : vector<8x32xf32> to vector<1x32xf32>
    %15 = vector.extract_strided_slice %11 {offsets = [3, 0], sizes = [1, 32], strides = [1, 1]} : vector<8x32xf32> to vector<1x32xf32>
    %16 = vector.extract_strided_slice %11 {offsets = [4, 0], sizes = [1, 32], strides = [1, 1]} : vector<8x32xf32> to vector<1x32xf32>
    %17 = vector.extract_strided_slice %11 {offsets = [5, 0], sizes = [1, 1], strides = [1, 1]} : vector<8x32xf32> to vector<1x1xf32>
    %cst = arith.constant dense<0.000000e+00> : vector<128x32xf32>
    %18 = tpu.matmul %1, %5, %cst {dimension_numbers = #tpu.dot_dimension_numbers<[1], [0], [0], [1], [0, 0, 1, 1], [], []>} : vector<128x128xbf16>, vector<128x32xbf16>, vector<128x32xf32> -> vector<128x32xf32>
    %19 = arith.truncf %18 : vector<128x32xf32> to vector<128x32xbf16>
    %cst_16 = arith.constant dense<0.000000e+00> : vector<128x32xf32>
    %20 = tpu.matmul %19, %6, %cst_16 {dimension_numbers = #tpu.dot_dimension_numbers<[1], [0], [0], [1], [0, 0, 1, 1], [], []>} : vector<128x32xbf16>, vector<32x32xbf16>, vector<128x32xf32> -> vector<128x32xf32>
    %21 = vector.broadcast %12 : vector<1x32xf32> to vector<128x32xf32>
    %22 = arith.addf %20, %21 : vector<128x32xf32>
    %cst_17 = arith.constant 0.000000e+00 : f32
    %23 = vector.broadcast %cst_17 : f32 to vector<128x32xf32>
    %24 = arith.maximumf %22, %23 : vector<128x32xf32>
    %25 = arith.truncf %24 : vector<128x32xf32> to vector<128x32xbf16>
    %cst_18 = arith.constant dense<0.000000e+00> : vector<128x32xf32>
    %26 = tpu.matmul %25, %7, %cst_18 {dimension_numbers = #tpu.dot_dimension_numbers<[1], [0], [0], [1], [0, 0, 1, 1], [], []>} : vector<128x32xbf16>, vector<32x32xbf16>, vector<128x32xf32> -> vector<128x32xf32>
    %27 = vector.broadcast %13 : vector<1x32xf32> to vector<128x32xf32>
    %28 = arith.addf %26, %27 : vector<128x32xf32>
    %29 = arith.truncf %28 : vector<128x32xf32> to vector<128x32xbf16>
    %cst_19 = arith.constant dense<0.000000e+00> : vector<128x32xf32>
    %30 = tpu.matmul %3, %29, %cst_19 {dimension_numbers = #tpu.dot_dimension_numbers<[1], [0], [0], [1], [0, 0, 1, 1], [], []>} : vector<128x128xbf16>, vector<128x32xbf16>, vector<128x32xf32> -> vector<128x32xf32>
    %c0_20 = arith.constant 0 : index
    %c0_21 = arith.constant 0 : index
    %c0_22 = arith.constant 0 : index
    %31 = vector.load %arg2[%c0_20, %c0_21, %c0_22] : memref<1x128x1xf32, #tpu.memory_space<vmem>>, vector<1x128x1xf32>
    %32 = vector.shape_cast %31 : vector<1x128x1xf32> to vector<128x1xf32>
    %33 = vector.broadcast %32 : vector<128x1xf32> to vector<128x32xf32>
    %34 = arith.mulf %30, %33 : vector<128x32xf32>
    %cst_23 = arith.constant dense<0.000000e+00> : vector<128x32xf32>
    %35 = tpu.matmul %29, %8, %cst_23 {dimension_numbers = #tpu.dot_dimension_numbers<[1], [0], [0], [1], [0, 0, 1, 1], [], []>} : vector<128x32xbf16>, vector<32x32xbf16>, vector<128x32xf32> -> vector<128x32xf32>
    %36 = arith.truncf %34 : vector<128x32xf32> to vector<128x32xbf16>
    %cst_24 = arith.constant dense<0.000000e+00> : vector<128x32xf32>
    %37 = tpu.matmul %36, %9, %cst_24 {dimension_numbers = #tpu.dot_dimension_numbers<[1], [0], [0], [1], [0, 0, 1, 1], [], []>} : vector<128x32xbf16>, vector<32x32xbf16>, vector<128x32xf32> -> vector<128x32xf32>
    %38 = arith.addf %35, %37 : vector<128x32xf32>
    %39 = vector.broadcast %14 : vector<1x32xf32> to vector<128x32xf32>
    %40 = arith.addf %38, %39 : vector<128x32xf32>
    %41 = vector.extract_strided_slice %40 {offsets = [0, 0], sizes = [32, 32], strides = [1, 1]} : vector<128x32xf32> to vector<32x32xf32>
    %cst_25 = arith.constant dense<0xFF800000> : vector<32xf32>
    %42 = vector.multi_reduction <maximumf>, %41, %cst_25 [0] : vector<32x32xf32> to vector<32xf32>
    %43 = vector.shape_cast %42 : vector<32xf32> to vector<1x32xf32>
    %44 = vector.extract_strided_slice %40 {offsets = [32, 0], sizes = [32, 32], strides = [1, 1]} : vector<128x32xf32> to vector<32x32xf32>
    %cst_26 = arith.constant dense<0xFF800000> : vector<32xf32>
    %45 = vector.multi_reduction <maximumf>, %44, %cst_26 [0] : vector<32x32xf32> to vector<32xf32>
    %46 = vector.shape_cast %45 : vector<32xf32> to vector<1x32xf32>
    %47 = vector.extract_strided_slice %40 {offsets = [64, 0], sizes = [32, 32], strides = [1, 1]} : vector<128x32xf32> to vector<32x32xf32>
    %cst_27 = arith.constant dense<0xFF800000> : vector<32xf32>
    %48 = vector.multi_reduction <maximumf>, %47, %cst_27 [0] : vector<32x32xf32> to vector<32xf32>
    %49 = vector.shape_cast %48 : vector<32xf32> to vector<1x32xf32>
    %50 = vector.extract_strided_slice %40 {offsets = [96, 0], sizes = [32, 32], strides = [1, 1]} : vector<128x32xf32> to vector<32x32xf32>
    %cst_28 = arith.constant dense<0xFF800000> : vector<32xf32>
    %51 = vector.multi_reduction <maximumf>, %50, %cst_28 [0] : vector<32x32xf32> to vector<32xf32>
    %52 = vector.shape_cast %51 : vector<32xf32> to vector<1x32xf32>
    %53 = tpu.concatenate %43, %46, %49, %52 in 0 : vector<1x32xf32>, vector<1x32xf32>, vector<1x32xf32>, vector<1x32xf32> -> vector<4x32xf32>
    %54 = arith.truncf %53 : vector<4x32xf32> to vector<4x32xbf16>
    %cst_29 = arith.constant dense<0.000000e+00> : vector<4x32xf32>
    %55 = tpu.matmul %54, %10, %cst_29 {dimension_numbers = #tpu.dot_dimension_numbers<[1], [0], [0], [1], [0, 0, 1, 1], [], []>} : vector<4x32xbf16>, vector<32x32xbf16>, vector<4x32xf32> -> vector<4x32xf32>
    %56 = vector.broadcast %15 : vector<1x32xf32> to vector<4x32xf32>
    %57 = arith.addf %55, %56 : vector<4x32xf32>
    %cst_30 = arith.constant 0.000000e+00 : f32
    %58 = vector.broadcast %cst_30 : f32 to vector<4x32xf32>
    %59 = arith.maximumf %57, %58 : vector<4x32xf32>
    %60 = vector.broadcast %16 : vector<1x32xf32> to vector<4x32xf32>
    %61 = arith.mulf %59, %60 : vector<4x32xf32>
    %cst_31 = arith.constant dense<0.000000e+00> : vector<4xf32>
    %62 = vector.multi_reduction <add>, %61, %cst_31 [1] : vector<4x32xf32> to vector<4xf32>
    %63 = vector.shape_cast %62 : vector<4xf32> to vector<4x1xf32>
    %64 = vector.broadcast %17 : vector<1x1xf32> to vector<4x1xf32>
    %65 = arith.addf %63, %64 : vector<4x1xf32>
    %cst_32 = arith.constant 0.000000e+00 : f32
    %66 = vector.broadcast %cst_32 : f32 to vector<4x1xf32>
    %67 = tpu.concatenate %65, %66 in 0 : vector<4x1xf32>, vector<4x1xf32> -> vector<8x1xf32>
    %68 = vector.shape_cast %67 : vector<8x1xf32> to vector<8x1xf32>
    %69 = vector.broadcast %68 : vector<8x1xf32> to vector<8x128xf32>
    %c0_33 = arith.constant 0 : index
    %c0_34 = arith.constant 0 : index
    %c0_35 = arith.constant 0 : index
    %70 = vector.load %arg6[%c0_33, %c0_34, %c0_35] : memref<1x8x128xf32, #tpu.memory_space<vmem>>, vector<1x8x128xf32>
    %71 = vector.shape_cast %70 : vector<1x8x128xf32> to vector<8x128xf32>
    %72 = vector.shape_cast %69 : vector<8x128xf32> to vector<1x8x128xf32>
    tpu.vector_store %arg6[%c0_33, %c0_34, %c0_35], %72 {strides = array<i32>} : memref<1x8x128xf32, #tpu.memory_space<vmem>>, vector<1x8x128xf32>,
    return
  }
  func.func @transform_0(%arg0: i32) -> (i32, i32, i32) {
    %c0_i32 = arith.constant 0 : i32
    %c0_i32_0 = arith.constant 0 : i32
    %c0_i32_1 = arith.constant 0 : i32
    return %arg0, %c0_i32, %c0_i32_0 : i32, i32, i32
  }
  func.func @transform_1(%arg0: i32) -> (i32, i32, i32) {
    %c0_i32 = arith.constant 0 : i32
    %c0_i32_0 = arith.constant 0 : i32
    %c0_i32_1 = arith.constant 0 : i32
    return %arg0, %c0_i32, %c0_i32_0 : i32, i32, i32
  }
  func.func @transform_2(%arg0: i32) -> (i32, i32, i32) {
    %c0_i32 = arith.constant 0 : i32
    %c0_i32_0 = arith.constant 0 : i32
    %c0_i32_1 = arith.constant 0 : i32
    return %arg0, %c0_i32, %c0_i32_0 : i32, i32, i32
  }
  func.func @transform_3(%arg0: i32) -> (i32, i32) {
    %c0_i32 = arith.constant 0 : i32
    %c0_i32_0 = arith.constant 0 : i32
    %c0_i32_1 = arith.constant 0 : i32
    return %c0_i32, %c0_i32_0 : i32, i32
  }
  func.func @transform_4(%arg0: i32) -> (i32, i32) {
    %c0_i32 = arith.constant 0 : i32
    %c0_i32_0 = arith.constant 0 : i32
    %c0_i32_1 = arith.constant 0 : i32
    return %c0_i32, %c0_i32_0 : i32, i32
  }
  func.func @transform_5(%arg0: i32) -> (i32, i32, i32) {
    %c0_i32 = arith.constant 0 : i32
    %c0_i32_0 = arith.constant 0 : i32
    %c0_i32_1 = arith.constant 0 : i32
    return %arg0, %c0_i32, %c0_i32_0 : i32, i32, i32
  }
}

</mosaic_0001>

<bundles_post_ra>
// kernel: tpu_custom_call.1
= control target key start
LH: loop header
LB: loop body
LE: loop exit
PB: predicated region body
PF: predicated region fallthrough
CT: control target
= control target key end

     0   :  { %10 = vsyncpa [#allocation3], 0  ;;  %s2418_s0 = inlined_call_operand.vmem [shape: bf16[2,256,128], index: 0, kind: input, shape index: {}]   ;;  %s2419_s1 = inlined_call_operand.vmem [shape: f32[2,128,1], index: 1, kind: input, shape index: {}]   ;;  %s2420_s2 = inlined_call_operand.vmem [shape: bf16[2,128,32], index: 2, kind: input, shape index: {}]   ;;  %s2421_s3 = inlined_call_operand.vmem [shape: bf16[160,32], index: 3, kind: input, shape index: {}]   ;;  %s2422_s4 = inlined_call_operand.vmem [shape: f32[8,32], index: 4, kind: input, shape index: {}]   ;;  %s2423_s5 = inlined_call_operand.hbm [shape: f32[2,8,128], index: 5, kind: output, shape index: {}]  }
   0x1   :  { %12 = vsyncpa [#allocation3 + $0x1], 0  ;;  %s2132_s18 = smov 0   ;;  %s2134_s19 = smov 0  }
   0x2   :  { %s2136_s20 = smov 0   ;;  %s2138_s21 = smov 0  }
   0x3 LB: > { %s2153_s22 = sadd.s32 4294967295, %s2096_s21   ;;  %s1630_s23 = sadd.s32 4294967294, %s2096_s21   ;;  %s2096_s21 = sphi %s2138_s21, %s2429_s21   ;;  %s2092_s20 = sphi %s2136_s20, %s2428_s20   ;;  %s2088_s19 = sphi %s2134_s19, %s2427_s19   ;;  %s2084_s18 = sphi %s2132_s18, %s2426_s18  }
   0x4   : > { %s2157_s24 = sadd.s32 1, %s2096_s21   ;;  %s145_s25 = sadd.s32 1, %s2092_s20 }
   0x5   : > { %s142_s26 = ssub.s32 %s2096_s21, %s2157_s24  ;;  %p155_p0 = scmp.ne.s32.totalorder %s2092_s20, %s2088_s19 }
   0x6   : > { %p143_p1 = scmp.eq.s32.totalorder %s142_s26, 0  ;;  %p156_p2 = scmp.eq.s32.totalorder %s2153_s22, 1 }
   0x7   : > { %p161_p3 = scmp.ne.s32.totalorder %s2088_s19, %s2084_s18  ;;  %p162_p4 = scmp.eq.s32.totalorder %s1630_s23, 1 }
   0x8   : > { %s2168_s27 = scalar_select %p143_p1, %s2092_s20, %s145_s25  }
   0x9   : > { %p2170_p5 = por %p156_p2, %p155_p0  ;;  %p2174_p6 = por %p162_p4, %p161_p3 }
   0xa   : > { %p1633_p7 = scmp.ge.s32.totalorder %s2096_s21, 1  ;;  %p210_p8 = scmp.lt.s32.totalorder %s2096_s21, 3 }
   0xc   : > { %p211_p9 = pnand %p1633_p7, %p210_p8 }
   0xd   : > { %p248_p10 = scmp.lt.s32.totalorder (!%p211_p9), %s2153_s22, 1  ;;  %s245_s8 = sand.u32 (!%p211_p9), 1, %s2088_s19  }
   0xe   : > { %214 = sbr.rel (%p211_p9) target bundleno = 1650 (0x672), region = 40  ;;  %s2101_s17 = smov (!%p211_p9), [#allocation2]  }
   0xf   : > { %s2040_s23 = sshll.u32 (!%p211_p9), %s2101_s17, 4  ;;  %s2041_s23 = int_to_ptr.vmem [resolvable:$false] %s2040_s23 }
  0x13   : > { %s2182_s30 = scalar_select %p248_p10, %s2153_s22, 1  ;;  %v2018_v16 = vld [vmem:[%s2421_s3 + $0x8] sm:$0xff]   ;;  %v2019_v17 = vld [vmem:[%s2421_s3] sm:$0xff]   ;;  %v2020_v18 = vld [vmem:[%s2421_s3 + $0x18] sm:$0xff]   ;;  %vm550_vm0 = vcmask 261120   ;;  %v534_v44 = vlaneseq  ;;  %vm2100_vm1 = vmmov 0  }
  0x14   : > { %1822 = vmatprep.subr.bf16.mxu1 %v2018_v16  ;;  %v2021_v26 = vld [vmem:[%s2421_s3 + $0x10] sm:$0xff]   ;;  %v2230_v47 = vld [vmem:[%s2422_s4] sm:$0xff]  ;;  %vm1444_vm2 = vcmask 1040384   ;;  %vm1446_vm3 = vcmask 1041408   ;;  %vm1448_vm4 = vcmask 1042432   ;;  %vm1516_vm5 = vcmask 257024  }
  0x15   : > { %s1714_s6 = sshll.u32 %s2182_s30, 6  ;;  %s1712_s10 = sshll.u32 %s2182_s30, 7  ;;  %1823 = vmatpush3.bf16.msra.mxu1 %v2018_v16  ;;  %v2224_v45 = vshrl.u32 %v534_v44, 7  ;;  %vm1525_vm6 = vcmask 1043456  }
  0x16   : > { %s262_s9 = scalar_lea.vmem %s2420_s2, %s1714_s6  ;;  %s2194_s13 = scalar_lea.vmem %s2418_s0, %s1712_s10  ;;  %1824 = vmatprep.subr.bf16.mxu1 %v2019_v17 }
  0x17   : > { %v2002_v0 = vld [vmem:[%s262_s9 + $0x38] sm:$0xff]   ;;  %v2003_v1 = vld [vmem:[%s262_s9 + $0x30] sm:$0xff]   ;;  %v2004_v2 = vld [vmem:[%s262_s9 + $0x28] sm:$0xff]   ;;  %v536_v46 = vsub.s32 0, %v2224_v45  ;;  %s2248_s12 = scalar_lea.vmem %s2419_s1, %s1712_s10  ;;  %s1709_s30 = sshll.u32 %s2153_s22, 7 }
  0x18   : > { %1790 = vmatprep.subr.bf16.mxu0 %v2002_v0  ;;  %v2005_v3 = vld [vmem:[%s262_s9 + $0x20] sm:$0xff]   ;;  %v2006_v5 = vld [vmem:[%s262_s9 + $0x18] sm:$0xff]   ;;  %v2007_v6 = vld [vmem:[%s262_s9 + $0x10] sm:$0xff]   ;;  %s1545_s15 = scalar_lea.hbm %s2423_s5, %s1709_s30  ;;  %s2042_s22 = scalar_lea.vmem %s2041_s23, 256 }
  0x19   : > { %1791 = vmatpush3.bf16.msra.mxu0 %v2002_v0  ;;  %v2010_v4 = vld [vmem:[%s2194_s13] sm:$0xff]   ;;  %v2008_v7 = vld [vmem:[%s262_s9 + $0x8] sm:$0xff]   ;;  %v2012_v10 = vld [vmem:[%s2194_s13 + $0x10] sm:$0xff]   ;;  %1825 = vmatpush3.bf16.msra.mxu1 %v2019_v17  ;;  %v537_v49 = vrot.slane %v2230_v47, %v536_v46 }
  0x1a   : > { %1792 = vmatprep.subr.bf16.mxu0 %v2003_v1  ;;  %1806 = vmatprep.mubr.bf16.mxu0 %v2010_v4  ;;  %v2009_v8 = vld [vmem:[%s262_s9] sm:$0xff]   ;;  %v2011_v9 = vld [vmem:[%s2194_s13 + $0x8] sm:$0xff]   ;;  %v2013_v11 = vld [vmem:[%s2194_s13 + $0x18] sm:$0xff]   ;;  %s1634_s9 = sshll.u32 %s245_s8, 3 }
  0x1b   : > { %v2014_v12 = vld [vmem:[%s2194_s13 + $0x20] sm:$0xff]   ;;  %v2015_v13 = vld [vmem:[%s2194_s13 + $0x28] sm:$0xff]   ;;  %v2016_v14 = vld [vmem:[%s2194_s13 + $0x30] sm:$0xff]   ;;  %1842 = vmatprep.subr.bf16.mxu1 %v2020_v18  ;;  %s247_s11 = scalar_lea.vmem [#allocation2], %s1634_s9 }
  0x1c   : > { %v2017_v15 = vld [vmem:[%s2194_s13 + $0x38] sm:$0xff]   ;;  %v986_v44 = vld [vmem:[%s2248_s12] sm:$0xff]  ;;  %v988_v46 = vld [vmem:[%s2248_s12 + $0x10] sm:$0xff] }
  0x1d   : > { %1793 = vmatpush3.bf16.msra.mxu0 %v2003_v1 }
  0x1e   : > { %1794 = vmatprep.subr.bf16.mxu0 %v2004_v2 }
  0x21   : > { %1795 = vmatpush3.bf16.msra.mxu0 %v2004_v2 }
  0x22   : > { %1796 = vmatprep.subr.bf16.mxu0 %v2005_v3 }
  0x25   : > { %1797 = vmatpush3.bf16.msra.mxu0 %v2005_v3 }
  0x26   : > { %1798 = vmatprep.subr.bf16.mxu0 %v2006_v5 }
  0x29   : > { %1799 = vmatpush3.bf16.msra.mxu0 %v2006_v5 }
  0x2a   : > { %1800 = vmatprep.subr.bf16.mxu0 %v2007_v6 }
  0x2d   : > { %1801 = vmatpush3.bf16.msra.mxu0 %v2007_v6 }
  0x2e   : > { %1802 = vmatprep.subr.bf16.mxu0 %v2008_v7 }
  0x31   : > { %1803 = vmatpush3.bf16.msra.mxu0 %v2008_v7 }
  0x32   : > { %1804 = vmatprep.subr.bf16.mxu0 %v2009_v8 }
  0x35   : > { %1805 = vmatpush3.bf16.msra.mxu0 %v2009_v8 }
  0x38   : > { %1807 = vmatmul.mubr.bf16.vlgmr.msra.gmra.mxu0 %v2011_v9 }
  0x39   : > { %1810 = vmatprep.mubr.bf16.mxu0 %v2012_v10 }
  0x40   : > { %1811 = vmatmul.mubr.bf16.gmra.mxu0 %v2013_v11 }
  0x41   : > { %1814 = vmatprep.mubr.bf16.mxu0 %v2014_v12 }
  0x48   : > { %1815 = vmatmul.mubr.bf16.gmra.mxu0 %v2015_v13 }
  0x49   : > { %1818 = vmatprep.mubr.bf16.mxu0 %v2016_v14 }
  0x50   : > { %1819 = vmatmul.mubr.bf16.gmra.mxu0 %v2017_v15 }
  0xf8   : > { %v1808_v19 = vpop.f32.mrf.mxu0 }
  0xfa   : > { %v463_v20 = vpop.f32.mrf.mxu0 }
  0xfc   : > { %v1809_v21 = vpop.f32.mrf.mxu0 }
  0xfd   : > { %v527_v24 = vpack.c.bf16 %v1809_v21, %v1808_v19 }
  0xfe   : > { %v466_v22 = vpop.f32.mrf.mxu0 }
  0xff   : > { %v526_v23 = vpack.c.bf16 %v466_v22, %v463_v20 }
 0x100   : > { %v1812_v25 = vpop.f32.mrf.mxu0 }
 0x101   : > { %1826 = vmatprep.mubr.msk.bf16.mxu1 %vm550_vm0, %v526_v23 }
 0x102   : > { %v479_v27 = vpop.f32.mrf.mxu0  ;;  %1827 = vmatmul.mubr.msk.bf16.vlgmr.msra.gmra.mxu1 %vm550_vm0, %v527_v24 }
 0x103   : > { %1843 = vmatpush3.bf16.msra.mxu1 %v2020_v18 }
 0x104   : > { %v1813_v28 = vpop.f32.mrf.mxu0  ;;  %1844 = vmatprep.subr.bf16.mxu1 %v2021_v26 }
 0x105   : > { %v529_v31 = vpack.c.bf16 %v1813_v28, %v1812_v25 }
 0x106   : > { %v482_v29 = vpop.f32.mrf.mxu0 }
 0x107   : > { %v528_v30 = vpack.c.bf16 %v482_v29, %v479_v27  ;;  %1845 = vmatpush3.bf16.msra.mxu1 %v2021_v26 }
 0x108   : > { %v1816_v32 = vpop.f32.mrf.mxu0 }
 0x109   : > { %1830 = vmatprep.mubr.msk.bf16.mxu1 %vm550_vm0, %v528_v30 }
 0x10a   : > { %v495_v33 = vpop.f32.mrf.mxu0  ;;  %1831 = vmatmul.mubr.msk.bf16.gmra.mxu1 %vm550_vm0, %v529_v31 }
 0x10c   : > { %v1817_v34 = vpop.f32.mrf.mxu0 }
 0x10d   : > { %v531_v37 = vpack.c.bf16 %v1817_v34, %v1816_v32 }
 0x10e   : > { %v498_v35 = vpop.f32.mrf.mxu0 }
 0x10f   : > { %v530_v36 = vpack.c.bf16 %v498_v35, %v495_v33 }
 0x110   : > { %v1820_v38 = vpop.f32.mrf.mxu0 }
 0x111   : > { %1834 = vmatprep.mubr.msk.bf16.mxu1 %vm550_vm0, %v530_v36 }
 0x112   : > { %v511_v39 = vpop.f32.mrf.mxu0  ;;  %1835 = vmatmul.mubr.msk.bf16.gmra.mxu1 %vm550_vm0, %v531_v37 }
 0x114   : > { %v1821_v40 = vpop.f32.mrf.mxu0 }
 0x115   : > { %v533_v43 = vpack.c.bf16 %v1821_v40, %v1820_v38 }
 0x116   : > { %v514_v41 = vpop.f32.mrf.mxu0 }
 0x117   : > { %v532_v42 = vpack.c.bf16 %v514_v41, %v511_v39  ;;  %v2022_v41 = vld [vmem:[%s2194_s13 + $0x40] sm:$0xff]  }
 0x118   : > { %1878 = vmatprep.mubr.bf16.mxu0 %v2022_v41  ;;  %v2024_v41 = vld [vmem:[%s2194_s13 + $0x48] sm:$0xff]  }
 0x119   : > { %1838 = vmatprep.mubr.msk.bf16.mxu1 %vm550_vm0, %v532_v42  ;;  %v2023_v42 = vld [vmem:[%s2194_s13 + $0x70] sm:$0xff]  }
 0x11a   : > { %1839 = vmatmul.mubr.msk.bf16.gmra.mxu1 %vm550_vm0, %v533_v43  ;;  %v2098_v43 = vmov 0  }
 0x11b   : > { %2000 = vset.pattern.permute.xlu0 %v2098_v43  ;;  %2001 = vset.pattern.permute.xlu1 %v2098_v43  ;;  %v2026_v43 = vld [vmem:[%s2194_s13 + $0x50] sm:$0xff]  }
 0x11c   : > { %1004 = vperm.xlu0 %2000, %v986_v44   ;;  %1014 = vperm.xlu1 %2001, %v988_v46   ;;  %v2031_v44 = vld [vmem:[%s2421_s3 + $0x20] sm:$0xff]   ;;  %v2027_v46 = vld [vmem:[%s2194_s13 + $0x58] sm:$0xff]  }
 0x1c2   : > { %v1828_v48 = vpop.f32.mrf.mxu1 }
 0x1c3   : > { %v618_v54 = vadd.f32 %v1828_v48, %v537_v49  ;;  %v987_v48 = vld [vmem:[%s2248_s12 + $0x8] sm:$0xff] }
 0x1c4   : > { %v609_v50 = vpop.f32.mrf.mxu1  ;;  %1009 = vperm.xlu0 %2000, %v987_v48   ;;  %v2028_v48 = vld [vmem:[%s2194_s13 + $0x60] sm:$0xff]  }
 0x1c5   : > { %v610_v52 = vadd.f32 %v609_v50, %v537_v49  ;;  %v674_v61 = vmax.f32 %v618_v54, 0.0  ;;  %v990_v50 = vld [vmem:[%s2248_s12 + $0x20] sm:$0xff] }
 0x1c6   : > { %v1829_v51 = vpop.f32.mrf.mxu1  ;;  %v994_v54 = vld [vmem:[%s2248_s12 + $0x40] sm:$0xff] }
 0x1c7   : > { %v621_v53 = vadd.f32 %v1829_v51, %v537_v49  ;;  %v672_v59 = vmax.f32 %v610_v52, 0.0  ;;  %v991_v51 = vld [vmem:[%s2248_s12 + $0x28] sm:$0xff]  ;;  %v992_v52 = vld [vmem:[%s2248_s12 + $0x30] sm:$0xff] }
 0x1c8   : > { %v612_v55 = vpop.f32.mrf.mxu1  ;;  %1024 = vperm.xlu0 %2000, %v990_v50   ;;  %v2032_v50 = vld [vmem:[%s2421_s3 + $0x38] sm:$0xff]  }
 0x1c9   : > { %v613_v56 = vadd.f32 %v612_v55, %v537_v49  ;;  %v675_v57 = vmax.f32 %v621_v53, 0.0  ;;  %v993_v53 = vld [vmem:[%s2248_s12 + $0x38] sm:$0xff]  ;;  %v995_v55 = vld [vmem:[%s2248_s12 + $0x48] sm:$0xff] }
 0x1ca   : > { %v1832_v58 = vpop.f32.mrf.mxu1 }
 0x1cb   : > { %v673_v60 = vmax.f32 %v613_v56, 0.0  ;;  %v689_v0 = vpack.c.bf16 %v675_v57, %v674_v61  ;;  %v634_v4 = vadd.f32 %v1832_v58, %v537_v49  ;;  %v996_v56 = vld [vmem:[%s2248_s12 + $0x50] sm:$0xff]  ;;  %v997_v57 = vld [vmem:[%s2248_s12 + $0x58] sm:$0xff]  ;;  %v999_v61 = vld [vmem:[%s2248_s12 + $0x68] sm:$0xff] }
 0x1cc   : > { %v625_v62 = vpop.f32.mrf.mxu1  ;;  %1034 = vperm.xlu0 %2000, %v992_v52   ;;  %v1015_v52 = vpop.permute.xlu1 %1014 }
 0x1cd   : > { %v688_v63 = vpack.c.bf16 %v673_v60, %v672_v59  ;;  %v626_v2 = vadd.f32 %v625_v62, %v537_v49  ;;  %v678_v11 = vmax.f32 %v634_v4, 0.0  ;;  %v998_v59 = vld [vmem:[%s2248_s12 + $0x60] sm:$0xff] }
 0x1ce   : > { %v1833_v1 = vpop.f32.mrf.mxu1 }
 0x1cf   : > { %v637_v3 = vadd.f32 %v1833_v1, %v537_v49  ;;  %1846 = vmatprep.mubr.msk.bf16.mxu1 %vm550_vm0, %v688_v63  ;;  %v676_v9 = vmax.f32 %v626_v2, 0.0  ;;  %v1000_v63 = vld [vmem:[%s2248_s12 + $0x70] sm:$0xff]  ;;  %v1001_v1 = vld [vmem:[%s2248_s12 + $0x78] sm:$0xff] }
 0x1d0   : > { %v628_v5 = vpop.f32.mrf.mxu1  ;;  %1847 = vmatmul.mubr.msk.bf16.vlgmr.msra.gmra.mxu1 %vm550_vm0, %v689_v0  ;;  %1044 = vperm.xlu0 %2000, %v994_v54  }
 0x1d1   : > { %v629_v6 = vadd.f32 %v628_v5, %v537_v49  ;;  %v679_v7 = vmax.f32 %v637_v3, 0.0 }
 0x1d2   : > { %v1836_v8 = vpop.f32.mrf.mxu1 }
 0x1d3   : > { %v677_v10 = vmax.f32 %v629_v6, 0.0  ;;  %v691_v14 = vpack.c.bf16 %v679_v7, %v678_v11  ;;  %v650_v18 = vadd.f32 %v1836_v8, %v537_v49 }
 0x1d4   : > { %v641_v12 = vpop.f32.mrf.mxu1  ;;  %1054 = vperm.xlu0 %2000, %v996_v56  }
 0x1d5   : > { %v690_v13 = vpack.c.bf16 %v677_v10, %v676_v9  ;;  %v642_v16 = vadd.f32 %v641_v12, %v537_v49  ;;  %v682_v25 = vmax.f32 %v650_v18, 0.0  ;;  %v698_v10 = vsub.s32 1, %v2224_v45 }
 0x1d6   : > { %v1837_v15 = vpop.f32.mrf.mxu1 }
 0x1d7   : > { %v653_v17 = vadd.f32 %v1837_v15, %v537_v49  ;;  %1850 = vmatprep.mubr.msk.bf16.mxu1 %vm550_vm0, %v690_v13  ;;  %v680_v23 = vmax.f32 %v642_v16, 0.0  ;;  %v699_v13 = vrot.slane %v2230_v47, %v698_v10 }
 0x1d8   : > { %v644_v19 = vpop.f32.mrf.mxu1  ;;  %1851 = vmatmul.mubr.msk.bf16.gmra.mxu1 %vm550_vm0, %v691_v14  ;;  %1064 = vperm.xlu0 %2000, %v998_v59  }
 0x1d9   : > { %v645_v20 = vadd.f32 %v644_v19, %v537_v49  ;;  %v683_v21 = vmax.f32 %v653_v17, 0.0 }
 0x1da   : > { %v1840_v22 = vpop.f32.mrf.mxu1 }
 0x1db   : > { %v681_v24 = vmax.f32 %v645_v20, 0.0  ;;  %v693_v28 = vpack.c.bf16 %v683_v21, %v682_v25  ;;  %v666_v32 = vadd.f32 %v1840_v22, %v537_v49 }
 0x1dc   : > { %v657_v26 = vpop.f32.mrf.mxu1  ;;  %1074 = vperm.xlu0 %2000, %v1000_v63  }
 0x1dd   : > { %v692_v27 = vpack.c.bf16 %v681_v24, %v680_v23  ;;  %v658_v30 = vadd.f32 %v657_v26, %v537_v49  ;;  %v686_v38 = vmax.f32 %v666_v32, 0.0 }
 0x1de   : > { %v1841_v29 = vpop.f32.mrf.mxu1 }
 0x1df   : > { %v669_v31 = vadd.f32 %v1841_v29, %v537_v49  ;;  %1854 = vmatprep.mubr.msk.bf16.mxu1 %vm550_vm0, %v692_v27  ;;  %v684_v36 = vmax.f32 %v658_v30, 0.0 }
 0x1e0   : > { %v660_v33 = vpop.f32.mrf.mxu1  ;;  %1855 = vmatmul.mubr.msk.bf16.gmra.mxu1 %vm550_vm0, %v693_v28 }
 0x1e1   : > { %v661_v34 = vadd.f32 %v660_v33, %v537_v49  ;;  %v687_v35 = vmax.f32 %v669_v31, 0.0  ;;  %v989_v49 = vld [vmem:[%s2248_s12 + $0x18] sm:$0xff]  ;;  %s1547_s12 = sshll.u32 %s247_s11, 4  ;;  %s2380_s12 = int_to_ptr.vmem [resolvable:$true] %s1547_s12 }
 0x1e2   : > { %1019 = vperm.xlu1 %2001, %v989_v49   ;;  %v2029_v49 = vld [vmem:[%s2194_s13 + $0x68] sm:$0xff]   ;;  %s2036_s16 = scalar_lea.vmem %s2380_s12, 128  ;;  %p2043_p0 = scmp.lt.s32.totalorder %s2380_s12, %s2041_s23 }
 0x1e3   : > { %v685_v37 = vmax.f32 %v661_v34, 0.0  ;;  %v695_v40 = vpack.c.bf16 %v687_v35, %v686_v38  ;;  %p2037_p11 = scmp.ne.s32.totalorder %s2380_s12, %s2036_s16  ;;  %p2044_p1 = scmp.lt.s32.totalorder %s2042_s22, %s2036_s16 }
 0x1e5   : > { %v694_v39 = vpack.c.bf16 %v685_v37, %v684_v36  ;;  %p2038_p12 = pnand %p2037_p11, %p2170_p5  ;;  %p2045_p2 = por %p2044_p1, %p2043_p0 }
 0x1e6   : > { %1029 = vperm.xlu1 %2001, %v991_v51   ;;  %v2033_v51 = vld [vmem:[%s2421_s3 + $0x30] sm:$0xff]  }
 0x1e7   : > { %1858 = vmatprep.mubr.msk.bf16.mxu1 %vm550_vm0, %v694_v39  ;;  %p2039_p13 = pneg %p2038_p12 }
 0x1e8   : > { %1859 = vmatmul.mubr.msk.bf16.gmra.mxu1 %vm550_vm0, %v695_v40  ;;  %v2030_v40 = vld [vmem:[%s2421_s3 + $0x28] sm:$0xff]  }
 0x1e9   : > { %1890 = vmatprep.mubr.bf16.mxu1 %v2023_v42  ;;  %v2025_v42 = vld [vmem:[%s2194_s13 + $0x78] sm:$0xff]   ;;  %s1534_s13 = scalar_lea.sflag [#allocation3], %s245_s8  ;;  %p2046_p3 = pnand %p2045_p2, %p2039_p13 }
 0x1ea   : > { %1039 = vperm.xlu1 %2001, %v993_v53   ;;  %v1005_v53 = vpop.permute.xlu0 %1004 }
 0x1ee   : > { %1049 = vperm.xlu1 %2001, %v995_v55  }
 0x1f2   : > { %1059 = vperm.xlu1 %2001, %v997_v57  }
 0x1f6   : > { %1069 = vperm.xlu1 %2001, %v999_v61  }
 0x1fa   : > { %1079 = vperm.xlu1 %2001, %v1001_v1  }
 0x23f   : > { %v1010_v55 = vpop.permute.xlu0 %1009 }
 0x243   : > { %v1025_v57 = vpop.permute.xlu0 %1024 }
 0x25d   : > { %v1020_v54 = vpop.permute.xlu1 %1019 }
 0x261   : > { %v1030_v56 = vpop.permute.xlu1 %1029 }
 0x290   : > { %v2262_v58 = vpop.f32.mrf.mxu1 }
 0x291   : > { %v779_v35 = vadd.f32 %v2262_v58, %v699_v13 }
 0x292   : > { %v2265_v60 = vpop.f32.mrf.mxu1 }
 0x293   : > { %v771_v38 = vadd.f32 %v2265_v60, %v699_v13  ;;  %v1040_v60 = vpop.permute.xlu1 %1039 }
 0x294   : > { %v1849_v62 = vpop.f32.mrf.mxu1 }
 0x295   : > { %v782_v33 = vadd.f32 %v1849_v62, %v699_v13  ;;  %v1035_v62 = vpop.permute.xlu0 %1034 }
 0x296   : > { %v773_v0 = vpop.f32.mrf.mxu1 }
 0x297   : > { %v834_v36 = vpack.c.bf16 %v782_v33, %v779_v35  ;;  %v774_v37 = vadd.f32 %v773_v0, %v699_v13 }
 0x298   : > { %v1852_v2 = vpop.f32.mrf.mxu1 }
 0x299   : > { %v795_v29 = vadd.f32 %v1852_v2, %v699_v13  ;;  %v833_v39 = vpack.c.bf16 %v774_v37, %v771_v38  ;;  %v1045_v10 = vpop.permute.xlu0 %1044 }
 0x29a   : > { %v786_v3 = vpop.f32.mrf.mxu1 }
 0x29b   : > { %v787_v32 = vadd.f32 %v786_v3, %v699_v13 }
 0x29c   : > { %v1853_v4 = vpop.f32.mrf.mxu1 }
 0x29d   : > { %v798_v27 = vadd.f32 %v1853_v4, %v699_v13 }
 0x29e   : > { %v789_v5 = vpop.f32.mrf.mxu1 }
 0x29f   : > { %v836_v30 = vpack.c.bf16 %v798_v27, %v795_v29  ;;  %v790_v31 = vadd.f32 %v789_v5, %v699_v13 }
 0x2a0   : > { %v1856_v6 = vpop.f32.mrf.mxu1 }
 0x2a1   : > { %v811_v23 = vadd.f32 %v1856_v6, %v699_v13  ;;  %v835_v34 = vpack.c.bf16 %v790_v31, %v787_v32  ;;  %v1050_v6 = vpop.permute.xlu1 %1049 }
 0x2a2   : > { %v802_v7 = vpop.f32.mrf.mxu1 }
 0x2a3   : > { %v803_v26 = vadd.f32 %v802_v7, %v699_v13 }
 0x2a4   : > { %v1857_v8 = vpop.f32.mrf.mxu1 }
 0x2a5   : > { %v814_v21 = vadd.f32 %v1857_v8, %v699_v13 }
 0x2a6   : > { %v805_v9 = vpop.f32.mrf.mxu1 }
 0x2a7   : > { %v2282_v24 = vpack.c.bf16 %v814_v21, %v811_v23  ;;  %v806_v25 = vadd.f32 %v805_v9, %v699_v13  ;;  %v1055_v21 = vpop.permute.xlu0 %1054 }
 0x2a8   : > { %v1860_v11 = vpop.f32.mrf.mxu1 }
 0x2a9   : > { %v827_v15 = vadd.f32 %v1860_v11, %v699_v13  ;;  %v837_v28 = vpack.c.bf16 %v806_v25, %v803_v26 }
 0x2aa   : > { %v818_v12 = vpop.f32.mrf.mxu1 }
 0x2ab   : > { %v819_v18 = vadd.f32 %v818_v12, %v699_v13 }
 0x2ac   : > { %v1861_v14 = vpop.f32.mrf.mxu1 }
 0x2ad   : > { %v830_v16 = vadd.f32 %v1861_v14, %v699_v13 }
 0x2ae   : > { %v821_v17 = vpop.f32.mrf.mxu1 }
 0x2af   : > { %v2272_v19 = vpack.c.bf16 %v830_v16, %v827_v15  ;;  %v822_v20 = vadd.f32 %v821_v17, %v699_v13  ;;  %v1060_v15 = vpop.permute.xlu1 %1059 }
 0x2b1   : > { %v2274_v22 = vpack.c.bf16 %v822_v20, %v819_v18  ;;  %1862 = vmatprep.subr.bf16.mxu0 %v2272_v19  ;;  %1942 = vmatprep.subr.bf16.mxu1 %v2272_v19 }
 0x2b2   : > { %1863 = vmatpush3.bf16.msra.mxu0 %v2272_v19  ;;  %1950 = vmatpush3.bf16.msra.mxu1 %v2272_v19 }
 0x2b3   : > { %1864 = vmatprep.subr.bf16.mxu0 %v2274_v22  ;;  %1943 = vmatprep.subr.bf16.mxu1 %v2274_v22  ;;  %v1070_v27 = vpop.permute.xlu1 %1069 }
 0x2b6   : > { %1865 = vmatpush3.bf16.msra.mxu0 %v2274_v22  ;;  %1951 = vmatpush3.bf16.msra.mxu1 %v2274_v22 }
 0x2b7   : > { %1866 = vmatprep.subr.bf16.mxu0 %v2282_v24  ;;  %1944 = vmatprep.subr.bf16.mxu1 %v2282_v24  ;;  %v1080_v38 = vpop.permute.xlu1 %1079 }
 0x2ba   : > { %1867 = vmatpush3.bf16.msra.mxu0 %v2282_v24  ;;  %1952 = vmatpush3.bf16.msra.mxu1 %v2282_v24 }
 0x2bb   : > { %1868 = vmatprep.subr.bf16.mxu0 %v837_v28  ;;  %1945 = vmatprep.subr.bf16.mxu1 %v837_v28 }
 0x2be   : > { %1869 = vmatpush3.bf16.msra.mxu0 %v837_v28  ;;  %1953 = vmatpush3.bf16.msra.mxu1 %v837_v28 }
 0x2bf   : > { %1870 = vmatprep.subr.bf16.mxu0 %v836_v30  ;;  %1946 = vmatprep.subr.bf16.mxu1 %v836_v30 }
 0x2c2   : > { %1871 = vmatpush3.bf16.msra.mxu0 %v836_v30  ;;  %1954 = vmatpush3.bf16.msra.mxu1 %v836_v30 }
 0x2c3   : > { %1872 = vmatprep.subr.bf16.mxu0 %v835_v34  ;;  %1947 = vmatprep.subr.bf16.mxu1 %v835_v34 }
 0x2c6   : > { %1873 = vmatpush3.bf16.msra.mxu0 %v835_v34  ;;  %1955 = vmatpush3.bf16.msra.mxu1 %v835_v34 }
 0x2c7   : > { %1874 = vmatprep.subr.bf16.mxu0 %v834_v36  ;;  %1948 = vmatprep.subr.bf16.mxu1 %v834_v36 }
 0x2ca   : > { %1875 = vmatpush3.bf16.msra.mxu0 %v834_v36  ;;  %1956 = vmatpush3.bf16.msra.mxu1 %v834_v36 }
 0x2cb   : > { %1876 = vmatprep.subr.bf16.mxu0 %v833_v39  ;;  %1949 = vmatprep.subr.bf16.mxu1 %v833_v39 }
 0x2ce   : > { %1877 = vmatpush3.bf16.msra.mxu0 %v833_v39  ;;  %1957 = vmatpush3.bf16.msra.mxu1 %v833_v39 }
 0x2cf   : > { %1914 = vmatprep.subr.bf16.mxu0 %v2030_v40  ;;  %1894 = vmatprep.subr.bf16.mxu1 %v2032_v50 }
 0x2d1   : > { %1879 = vmatmul.mubr.bf16.vlgmr.msra.gmra.mxu0 %v2024_v41  ;;  %1891 = vmatmul.mubr.bf16.vlgmr.msra.gmra.mxu1 %v2025_v42 }
 0x2d2   : > { %1882 = vmatprep.mubr.bf16.mxu0 %v2026_v43  ;;  %1915 = vmatpush3.bf16.msra.mxu0 %v2030_v40 }
 0x2d3   : > { %1916 = vmatprep.subr.bf16.mxu0 %v2031_v44  ;;  %1895 = vmatpush3.bf16.msra.mxu1 %v2032_v50 }
 0x2d4   : > { %1896 = vmatprep.subr.bf16.mxu1 %v2033_v51 }
 0x2d6   : > { %1917 = vmatpush3.bf16.msra.mxu0 %v2031_v44  ;;  %v2034_v44 = vld [vmem:[%s2421_s3 + $0x48] sm:$0xff]  }
 0x2d7   : > { %1897 = vmatpush3.bf16.msra.mxu1 %v2033_v51 }
 0x2d9   : > { %1883 = vmatmul.mubr.bf16.gmra.mxu0 %v2027_v46  ;;  %v2099_v46 = vmov 0.0  }
 0x2da   : > { %1886 = vmatprep.mubr.bf16.mxu0 %v2028_v48  ;;  %1934 = vmatprep.subr.bf16.mxu1 %v2099_v46  ;;  %v2035_v48 = vld [vmem:[%s2421_s3 + $0x40] sm:$0xff]  }
 0x2e1   : > { %1887 = vmatmul.mubr.bf16.gmra.mxu0 %v2029_v49 }
 0x2e2   : > { %1918 = vmatprep.mubr.msk.bf16.mxu0 %vm550_vm0, %v833_v39 }
 0x2e9   : > { %1919 = vmatmul.mubr.msk.bf16.vlgmr.msra.gmra.mxu0 %vm550_vm0, %v834_v36 }
 0x2ea   : > { %1922 = vmatprep.mubr.msk.bf16.mxu0 %vm550_vm0, %v835_v34 }
 0x2f1   : > { %1923 = vmatmul.mubr.msk.bf16.gmra.mxu0 %vm550_vm0, %v836_v30  ;;  %v1065_v30 = vpop.permute.xlu0 %1064 }
 0x2f2   : > { %1926 = vmatprep.mubr.msk.bf16.mxu0 %vm550_vm0, %v837_v28 }
 0x2f5   : > { %v1075_v40 = vpop.permute.xlu0 %1074 }
 0x2f9   : > { %1927 = vmatmul.mubr.msk.bf16.gmra.mxu0 %vm550_vm0, %v2282_v24 }
 0x2fa   : > { %1930 = vmatprep.mubr.msk.bf16.mxu0 %vm550_vm0, %v2274_v22 }
 0x301   : > { %1931 = vmatmul.mubr.msk.bf16.gmra.mxu0 %vm550_vm0, %v2272_v19 }
 0x391   : > { %v1880_v58 = vpop.f32.mrf.mxu0  ;;  %v1892_v4 = vpop.f32.mrf.mxu1 }
 0x392   : > { %v1084_v3 = vmul.f32 %v1880_v58, %v1015_v52  ;;  %v1096_v42 = vmul.f32 %v1892_v4, %v1075_v40 }
 0x393   : > { %v923_v59 = vpop.f32.mrf.mxu0  ;;  %v971_v11 = vpop.f32.mrf.mxu1 }
 0x394   : > { %v1082_v1 = vmul.f32 %v1005_v53, %v923_v59  ;;  %v1094_v35 = vmul.f32 %v1065_v30, %v971_v11 }
 0x395   : > { %v1881_v61 = vpop.f32.mrf.mxu0  ;;  %v1893_v18 = vpop.f32.mrf.mxu1 }
 0x396   : > { %v1085_v63 = vmul.f32 %v1881_v61, %v1020_v54  ;;  %v1097_v41 = vmul.f32 %v1893_v18, %v1080_v38 }
 0x397   : > { %v926_v0 = vpop.f32.mrf.mxu0  ;;  %v974_v25 = vpop.f32.mrf.mxu1 }
 0x398   : > { %v1083_v2 = vmul.f32 %v1010_v55, %v926_v0  ;;  %v1099_v8 = vpack.c.bf16 %v1085_v63, %v1084_v3  ;;  %v1095_v31 = vmul.f32 %v1070_v27, %v974_v25  ;;  %v1105_v43 = vpack.c.bf16 %v1097_v41, %v1096_v42 }
 0x399   : > { %v1884_v5 = vpop.f32.mrf.mxu0  ;;  %v1374_v63 = vsub.s32 2, %v2224_v45 }
 0x39a   : > { %v1098_v7 = vpack.c.bf16 %v1083_v2, %v1082_v1  ;;  %v1088_v19 = vmul.f32 %v1884_v5, %v1035_v62  ;;  %v1104_v39 = vpack.c.bf16 %v1095_v31, %v1094_v35 }
 0x39b   : > { %v939_v9 = vpop.f32.mrf.mxu0 }
 0x39c   : > { %1898 = vmatprep.mubr.msk.bf16.mxu1 %vm550_vm0, %v1098_v7  ;;  %v1086_v16 = vmul.f32 %v1025_v57, %v939_v9 }
 0x39d   : > { %v1885_v12 = vpop.f32.mrf.mxu0  ;;  %1899 = vmatmul.mubr.msk.bf16.vlgmr.msra.gmra.mxu1 %vm550_vm0, %v1099_v8 }
 0x39e   : > { %v1089_v13 = vmul.f32 %v1885_v12, %v1040_v60  ;;  %1935 = vmatpush3.bf16.msra.mxu1 %v2034_v44 }
 0x39f   : > { %v942_v14 = vpop.f32.mrf.mxu0  ;;  %1936 = vmatprep.subr.bf16.mxu1 %v2099_v46 }
 0x3a0   : > { %v1087_v17 = vmul.f32 %v1030_v56, %v942_v14  ;;  %v1101_v23 = vpack.c.bf16 %v1089_v13, %v1088_v19 }
 0x3a1   : > { %v1888_v20 = vpop.f32.mrf.mxu0 }
 0x3a2   : > { %v1100_v22 = vpack.c.bf16 %v1087_v17, %v1086_v16  ;;  %v1092_v34 = vmul.f32 %v1888_v20, %v1055_v21  ;;  %1937 = vmatpush3.bf16.msra.mxu1 %v2035_v48 }
 0x3a3   : > { %v955_v24 = vpop.f32.mrf.mxu0 }
 0x3a4   : > { %1902 = vmatprep.mubr.msk.bf16.mxu1 %vm550_vm0, %v1100_v22  ;;  %v1090_v32 = vmul.f32 %v1045_v10, %v955_v24 }
 0x3a5   : > { %v1889_v26 = vpop.f32.mrf.mxu0  ;;  %1903 = vmatmul.mubr.msk.bf16.gmra.mxu1 %vm550_vm0, %v1101_v23 }
 0x3a6   : > { %v1093_v28 = vmul.f32 %v1889_v26, %v1060_v15 }
 0x3a7   : > { %v958_v29 = vpop.f32.mrf.mxu0 }
 0x3a8   : > { %v1091_v33 = vmul.f32 %v1050_v6, %v958_v29  ;;  %v1103_v37 = vpack.c.bf16 %v1093_v28, %v1092_v34  ;;  %v2337_v6 = vrot.slane %v2230_v47, %v1374_v63 }
 0x3a9   : > { %v1920_v49 = vpop.f32.mrf.mxu0 }
 0x3aa   : > { %v1102_v36 = vpack.c.bf16 %v1091_v33, %v1090_v32 }
 0x3ab   : > { %v1309_v50 = vpop.f32.mrf.mxu0 }
 0x3ac   : > { %1906 = vmatprep.mubr.msk.bf16.mxu1 %vm550_vm0, %v1102_v36 }
 0x3ad   : > { %1907 = vmatmul.mubr.msk.bf16.gmra.mxu1 %vm550_vm0, %v1103_v37  ;;  %v1921_v51 = vpop.f32.mrf.mxu0 }
 0x3ae   : > { %1910 = vmatprep.mubr.msk.bf16.mxu1 %vm550_vm0, %v1104_v39 }
 0x3af   : > { %v1312_v52 = vpop.f32.mrf.mxu0 }
 0x3b1   : > { %v1924_v53 = vpop.f32.mrf.mxu0 }
 0x3b3   : > { %v1325_v54 = vpop.f32.mrf.mxu0 }
 0x3b5   : > { %1911 = vmatmul.mubr.msk.bf16.gmra.mxu1 %vm550_vm0, %v1105_v43  ;;  %v1925_v55 = vpop.f32.mrf.mxu0 }
 0x3b6   : > { %1938 = vmatprep.mubr.msk.bf16.mxu1 %vm2100_vm1, %v2099_v46 }
 0x3b7   : > { %v1328_v56 = vpop.f32.mrf.mxu0 }
 0x3b9   : > { %v1928_v58 = vpop.f32.mrf.mxu0 }
 0x3bb   : > { %v1341_v61 = vpop.f32.mrf.mxu0 }
 0x3bd   : > { %v1929_v2 = vpop.f32.mrf.mxu0 }
 0x3bf   : > { %v1344_v13 = vpop.f32.mrf.mxu0 }
 0x3c1   : > { %v1932_v26 = vpop.f32.mrf.mxu0 }
 0x3c3   : > { %v1357_v41 = vpop.f32.mrf.mxu0 }
 0x45d   : > { %v1900_v57 = vpop.f32.mrf.mxu1 }
 0x45e   : > { %v1318_v10 = vadd.f32 %v1920_v49, %v1900_v57 }
 0x45f   : > { %v1176_v59 = vpop.f32.mrf.mxu1 }
 0x460   : > { %v1310_v3 = vadd.f32 %v1309_v50, %v1176_v59  ;;  %v1378_v22 = vadd.f32 %v2337_v6, %v1318_v10 }
 0x461   : > { %v1901_v60 = vpop.f32.mrf.mxu1 }
 0x462   : > { %v1321_v4 = vadd.f32 %v1921_v51, %v1901_v60  ;;  %v1376_v14 = vadd.f32 %v2337_v6, %v1310_v3  ;;  %v1394_v39 = vsel %vm550_vm0, %v1378_v22, -inf }
 0x463   : > { %v1179_v62 = vpop.f32.mrf.mxu1 }
 0x464   : > { %v1313_v1 = vadd.f32 %v1312_v52, %v1179_v62  ;;  %v1379_v15 = vadd.f32 %v2337_v6, %v1321_v4  ;;  %v1392_v27 = vsel %vm550_vm0, %v1376_v14, -inf }
 0x465   : > { %v1904_v0 = vpop.f32.mrf.mxu1 }
 0x466   : > { %v1334_v7 = vadd.f32 %v1924_v53, %v1904_v0  ;;  %v1377_v11 = vadd.f32 %v2337_v6, %v1313_v1  ;;  %v1395_v28 = vsel %vm550_vm0, %v1379_v15, -inf }
 0x467   : > { %v1192_v5 = vpop.f32.mrf.mxu1  ;;  %v1397_v42 = vmax.f32 %v1394_v39, %v1395_v28 }
 0x468   : > { %v1326_v8 = vadd.f32 %v1325_v54, %v1192_v5  ;;  %v1382_v17 = vadd.f32 %v2337_v6, %v1334_v7  ;;  %v1393_v23 = vsel %vm550_vm0, %v1377_v11, -inf }
 0x469   : > { %v1905_v9 = vpop.f32.mrf.mxu1  ;;  %v1396_v35 = vmax.f32 %v1392_v27, %v1393_v23 }
 0x46a   : > { %v1337_v12 = vadd.f32 %v1925_v55, %v1905_v9  ;;  %v1380_v18 = vadd.f32 %v2337_v6, %v1326_v8  ;;  %v1407_v31 = vsel %vm550_vm0, %v1382_v17, -inf  ;;  %v1933_v55 = vpop.f32.mrf.mxu0 }
 0x46b   : > { %v1195_v16 = vpop.f32.mrf.mxu1  ;;  %v1398_v51 = vmax.f32 %v1396_v35, %v1397_v42 }
 0x46c   : > { %v1383_v19 = vadd.f32 %v2337_v6, %v1337_v12  ;;  %v1329_v20 = vadd.f32 %v1328_v56, %v1195_v16  ;;  %v1405_v32 = vsel %vm550_vm0, %v1380_v18, -inf  ;;  %v1360_v4 = vpop.f32.mrf.mxu0 }
 0x46d   : > { %v1908_v21 = vpop.f32.mrf.mxu1  ;;  %v1399_v63 = vrot.slane %v1398_v51, 4 }
 0x46e   : > { %v1408_v24 = vsel %vm550_vm0, %v1383_v19, -inf  ;;  %v1381_v25 = vadd.f32 %v2337_v6, %v1329_v20  ;;  %v1350_v29 = vadd.f32 %v1928_v58, %v1908_v21 }
 0x46f   : > { %v1208_v30 = vpop.f32.mrf.mxu1  ;;  %v1410_v36 = vmax.f32 %v1407_v31, %v1408_v24 }
 0x470   : > { %v1406_v33 = vsel %vm550_vm0, %v1381_v25, -inf  ;;  %v1342_v34 = vadd.f32 %v1341_v61, %v1208_v30  ;;  %v1386_v44 = vadd.f32 %v2337_v6, %v1350_v29 }
 0x471   : > { %v1409_v37 = vmax.f32 %v1405_v32, %v1406_v33  ;;  %v1909_v38 = vpop.f32.mrf.mxu1 }
 0x472   : > { %v1353_v40 = vadd.f32 %v1929_v2, %v1909_v38  ;;  %v1384_v48 = vadd.f32 %v2337_v6, %v1342_v34  ;;  %v1420_v57 = vsel %vm550_vm0, %v1386_v44, -inf }
 0x473   : > { %v1411_v43 = vmax.f32 %v1409_v37, %v1410_v36  ;;  %v1211_v46 = vpop.f32.mrf.mxu1 }
 0x474   : > { %v1387_v49 = vadd.f32 %v2337_v6, %v1353_v40  ;;  %v1345_v50 = vadd.f32 %v1344_v13, %v1211_v46  ;;  %v1418_v59 = vsel %vm550_vm0, %v1384_v48, -inf  ;;  %v1400_v13 = vmax.f32 %v1398_v51, %v1399_v63 }
 0x475   : > { %v1912_v52 = vpop.f32.mrf.mxu1  ;;  %v1412_v56 = vrot.slane %v1411_v43, 4  ;;  %v1453_v46 = vsub.s32 3, %v2224_v45 }
 0x476   : > { %v1421_v53 = vsel %vm550_vm0, %v1387_v49, -inf  ;;  %v1385_v54 = vadd.f32 %v2337_v6, %v1345_v50  ;;  %v1366_v61 = vadd.f32 %v1932_v26, %v1912_v52  ;;  %v1401_v22 = vrot.slane %v1400_v13, 2 }
 0x477   : > { %v1224_v58 = vpop.f32.mrf.mxu1  ;;  %v1423_v0 = vmax.f32 %v1420_v57, %v1421_v53  ;;  %v1413_v5 = vmax.f32 %v1411_v43, %v1412_v56  ;;  %v1454_v48 = vrot.slane %v2230_v47, %v1453_v46  ;;  %v1513_v49 = vsub.s32 4, %v2224_v45 }
 0x478   : > { %v1419_v60 = vsel %vm550_vm0, %v1385_v54, -inf  ;;  %v1358_v62 = vadd.f32 %v1357_v41, %v1224_v58  ;;  %v1390_v9 = vadd.f32 %v2337_v6, %v1366_v61  ;;  %v1402_v29 = vmax.f32 %v1400_v13, %v1401_v22 }
 0x479   : > { %v1422_v1 = vmax.f32 %v1418_v59, %v1419_v60  ;;  %v1913_v2 = vpop.f32.mrf.mxu1  ;;  %v1414_v17 = vrot.slane %v1413_v5, 2  ;;  %v1514_v52 = vrot.slane %v2230_v47, %v1513_v49  ;;  %v1522_v59 = vsub.s32 5, %v2224_v45 }
 0x47a   : > { %v1369_v3 = vadd.f32 %v1933_v55, %v1913_v2  ;;  %v1388_v10 = vadd.f32 %v2337_v6, %v1358_v62  ;;  %v1433_v19 = vsel %vm550_vm0, %v1390_v9, -inf  ;;  %v1403_v33 = vrot.slane %v1402_v29, 1 }
 0x47b   : > { %v1424_v7 = vmax.f32 %v1422_v1, %v1423_v0  ;;  %v1227_v8 = vpop.f32.mrf.mxu1  ;;  %v1415_v26 = vmax.f32 %v1413_v5, %v1414_v17  ;;  %v1523_v60 = vrot.slane %v2230_v47, %v1522_v59 }
 0x47c   : > { %v1391_v11 = vadd.f32 %v2337_v6, %v1369_v3  ;;  %v1361_v12 = vadd.f32 %v1360_v4, %v1227_v8  ;;  %v1431_v20 = vsel %vm550_vm0, %v1388_v10, -inf  ;;  %v1404_v38 = vmax.f32 %v1402_v29, %v1403_v33 }
 0x47d   : > { %v1425_v14 = vrot.slane %v1424_v7, 4  ;;  %v1416_v31 = vrot.slane %v1415_v26, 1 }
 0x47e   : > { %v1434_v15 = vsel %vm550_vm0, %v1391_v11, -inf  ;;  %v1389_v16 = vadd.f32 %v2337_v6, %v1361_v12 }
 0x47f   : > { %v1426_v18 = vmax.f32 %v1424_v7, %v1425_v14  ;;  %v1436_v24 = vmax.f32 %v1433_v19, %v1434_v15  ;;  %v1417_v35 = vmax.f32 %v1415_v26, %v1416_v31 }
 0x480   : > { %v1432_v21 = vsel %vm550_vm0, %v1389_v16, -inf }
 0x481   : > { %v1427_v23 = vrot.slane %v1426_v18, 2  ;;  %v1435_v25 = vmax.f32 %v1431_v20, %v1432_v21  ;;  %v1445_v40 = vsel %vm1444_vm2, %v1404_v38, %v1417_v35 }
 0x483   : > { %v1437_v27 = vmax.f32 %v1435_v25, %v1436_v24  ;;  %v1428_v28 = vmax.f32 %v1426_v18, %v1427_v23 }
 0x485   : > { %v1438_v30 = vrot.slane %v1437_v27, 4  ;;  %v1429_v6 = vrot.slane %v1428_v28, 1 }
 0x487   : > { %v1439_v32 = vmax.f32 %v1437_v27, %v1438_v30  ;;  %v1430_v37 = vmax.f32 %v1428_v28, %v1429_v6 }
 0x489   : > { %v1440_v34 = vrot.slane %v1439_v32, 2  ;;  %v1447_v42 = vsel %vm1446_vm3, %v1445_v40, %v1430_v37 }
 0x48b   : > { %v1441_v36 = vmax.f32 %v1439_v32, %v1440_v34 }
 0x48d   : > { %v1442_v39 = vrot.slane %v1441_v36, 1 }
 0x48f   : > { %v1443_v41 = vmax.f32 %v1441_v36, %v1442_v39 }
 0x491   : > { %v1449_v43 = vsel %vm1448_vm4, %v1447_v42, %v1443_v41 }
 0x492   : > { %v1450_v44 = vpack.c.bf16 %v1449_v43, %v1449_v43 }
 0x494   : > { %1939 = vmatmul.mubr.msk.bf16.vlgmr.msra.gmra.mxu1 %vm550_vm0, %v1450_v44 }
 0x554   : > { %v1504_v50 = vpop.f32.mrf.mxu1 }
 0x555   : > { %v1505_v51 = vadd.f32 %v1504_v50, %v1454_v48 }
 0x556   : > { %v1940_v53 = vpop.f32.mrf.mxu1 }
 0x557   : > { %v1510_v54 = vmax.f32 %v1505_v51, 0.0 }
 0x558   : > { %v1507_v55 = vpop.f32.mrf.mxu1 }
 0x559   : > { %v1515_v56 = vmul.f32 %v1514_v52, %v1510_v54 }
 0x55a   : > { %v1941_v57 = vpop.f32.mrf.mxu1 }
 0x55b   : > { %v1517_v58 = vsel %vm1516_vm5, %v1515_v56, 0.0 }
 0x55c   : > { %1518 = vadd.xlane.f32.xlu0 %v1517_v58 }
 0x5e5   : > { %v1519_v61 = vpop.xlane.xlu0 %1518 }
 0x5e6   : > { %v1524_v62 = vadd.f32 %v1523_v60, %v1519_v61 }
 0x5e8   : > { %v1526_v63 = vsel %vm1525_vm6, %v1524_v62, 0.0 }
 0x5e9   : > { %1529 = vperm.xlu1 %2001, %v1526_v63  }
 0x664   : > { %v1530_v45 = vpop.permute.xlu1 %1529 }
 0x665   : > { %1532 = vst [vmem:[%s247_s11] sm:$0xff] %v1530_v45 }
 0x666   : > { %2049 = shalt.err (!%p2046_p3)
}
 0x667   : > { %s2050_s25 = scalar_lea.hbm %s1545_s15, 128  ;;  %s2054_s7 = scalar_lea.hbm %s2423_s5, 256 }
 0x668   : > { %p2051_p4 = scmp.ne.s32.totalorder %s1545_s15, %s2050_s25  ;;  %p2055_p9 = scmp.lt.s32.totalorder %s1545_s15, %s2423_s5 }
 0x669   : > { %p2056_p10 = scmp.lt.s32.totalorder %s2054_s7, %s2050_s25 }
 0x66a   : > { %p2052_p7 = pnand %p2051_p4, %p2170_p5 }
 0x66b   : > { %p2057_p11 = por %p2056_p10, %p2055_p9 }
 0x66c   : > { %p2053_p8 = pneg %p2052_p7 }
 0x66e   : > { %p2058_p12 = pnand %p2057_p11, %p2053_p8 }
 0x670   : > { %2061 = shalt.err (!%p2058_p12)
}
 0x671   : > { %1958 = dma.vmem_to_hbm [thread:$0]  (%p2170_p5), %s2380_s12, 128, %s1545_s15, %s1534_s13  }
 0x672 PF: > { %p1964_p13 = scmp.ge.s32.totalorder %s2096_s21, 2  ;;  %s1559_s11 = sand.u32 1, %s2084_s18  }
 0x673   : > { %s1560_s30 = scalar_lea.sflag [#allocation3], %s1559_s11 }
 0x674   : > { %p1961_p0 = pnand %p1964_p13, %p2174_p6 }
 0x676   : > { %p1962_p1 = pneg %p1961_p0 }
 0x678   : > { %2079 = dma.done.wait (%p1962_p1), %s1560_s30, 128  }
 0x679   : > { %2081 = vsyncadd (%p1962_p1), %s1560_s30, 4294967168  ;;  %p15_p2 = scmp.ge.s32.totalorder %s2157_s24, 4   ;;  %s2426_s18 = smov %s2088_s19 }
 0x67a   : > { %s2427_s19 = smov %s2092_s20  ;;  %s2428_s20 = smov %s2168_s27 }
 0x67b   : > { %s2429_s21 = smov %s2157_s24  ;;  %17 = sbr.rel (!%p15_p2) target bundleno = 3 (0x3), region = 81 }
 0x680   :  { %1565 = vsyncpa [#allocation3], 1 }
 0x681   :  { %1567 = vsyncpa [#allocation3 + $0x1], 1 }

</bundles_post_ra>
